<compile_context>
chip_gen: v5e
topology: v5e:2x2
jax: 0.10.0
libtpu: 0.0.40
codegen_flags: <defaults>
</compile_context>

<pallas_src>
import functools

import jax
import jax.numpy as jnp
from jax import lax
from jax.experimental import pallas as pl
from jax.experimental.pallas import tpu as pltpu


def _pick_group_size(num_heads, head_dim, target_lanes=256):
    """Largest divisor of num_heads with group_size*head_dim <= target_lanes."""
    g = 1
    for cand in range(1, num_heads + 1):
        if num_heads % cand == 0 and cand * head_dim <= target_lanes:
            g = cand
    return g


def prepare_attention_params(wqkv, bqkv, wproj, bproj, *, num_heads,
                             group_size=None, target_lanes=256,
                             param_dtype=None):
    """One-time host-side weight prep (hoisted out of the forward path).

    - folds the softmax scale into the q columns of Wqkv / bqkv,
    - rearranges Wqkv / bqkv / Wproj into head-group-major layouts so every
      in-kernel slice is static,
    - optionally casts parameters (e.g. to bf16 for the fast MXU path).
    Weights are stored (in_features, out_features): kernel computes x @ W + b.
    """
    C = wproj.shape[0]
    assert wqkv.shape == (C, 3 * C), wqkv.shape
    assert C % num_heads == 0
    hd = C // num_heads
    G = group_size if group_size is not None else _pick_group_size(
        num_heads, hd, target_lanes)
    assert num_heads % G == 0
    NG = num_heads // G
    Ghd = G * hd
    scale = hd ** (-0.5)

    bqkv_flat = bqkv.reshape(3 * C)
    bproj_flat = bproj.reshape(1, C)

    # Fold the softmax scale into the q third of Wqkv / bqkv.
    col_scale = jnp.concatenate([
        jnp.full((C,), scale, dtype=wqkv.dtype),
        jnp.ones((2 * C,), dtype=wqkv.dtype)])
    wqkv_s = wqkv * col_scale[None, :]
    bqkv_s = bqkv_flat * col_scale

    # QKV output columns are ordered (which, head, d) in the PyTorch module.
    # Regroup them as (group, [which, head_in_group, d]) so each group step
    # reads one contiguous (C, 3*Ghd) slab and slices heads statically.
    wqkv_g = (wqkv_s.reshape(C, 3, NG, G, hd)
                     .transpose(2, 0, 1, 3, 4)
                     .reshape(NG, C, 3 * Ghd))
    bqkv_g = (bqkv_s.reshape(3, NG, G, hd)
                     .transpose(1, 0, 2, 3)
                     .reshape(NG, 1, 3 * Ghd))
    # Wproj rows are ordered (head, d) -> grouped (NG, Ghd, C).
    wproj_g = wproj.reshape(NG, Ghd, C)

    if param_dtype is not None:
        wqkv_g = wqkv_g.astype(param_dtype)
        bqkv_g = bqkv_g.astype(param_dtype)
        wproj_g = wproj_g.astype(param_dtype)
        bproj_flat = bproj_flat.astype(param_dtype)

    return dict(wqkv=wqkv_g, bqkv=bqkv_g, wproj=wproj_g, bproj=bproj_flat,
                num_heads=num_heads, head_dim=hd, group_size=G, num_groups=NG)


def _attention_kernel(x_ref, wqkv_ref, bqkv_ref, wproj_ref, bproj_ref,
                      o_ref, obuf_ref, acc_ref, *, group_size, head_dim):
    """Grid step = (batch b, head-group g). All matmuls are lane-dense 2-D dots."""
    g = pl.program_id(1)

    @pl.when(g == 0)
    def _():
        acc_ref[...] = jnp.zeros_like(acc_ref)

    x = x_ref[0]                              # (N, C), kept in the input dtype
    dt = x.dtype
    G, hd = group_size, head_dim
    Ghd = G * hd

    # Fused QKV projection for this head group: (N, C) @ (C, 3*Ghd).
    # The softmax scale is already folded into the q columns on the host.
    qkv = (jnp.dot(x, wqkv_ref[g], preferred_element_type=jnp.float32)
           + bqkv_ref[g]).astype(dt)          # (N, 3*Ghd)

    # Per-head attention inside the group (short static unroll, all slices
    # at static lane offsets).
    for hh in range(G):
        q = qkv[:, hh * hd:(hh + 1) * hd]                          # (N, hd)
        k = qkv[:, Ghd + hh * hd:Ghd + (hh + 1) * hd]              # (N, hd)
        v = qkv[:, 2 * Ghd + hh * hd:2 * Ghd + (hh + 1) * hd]      # (N, hd)

        # q @ k^T without an explicit transpose: contract head_dim of both.
        s = lax.dot_general(q, k, (((1,), (1,)), ((), ())),
                            preferred_element_type=jnp.float32)    # (N, N) f32

        # Numerically stable softmax in f32; the divide goes to the EUP.
        m = jnp.max(s, axis=-1, keepdims=True)
        e = jnp.exp(s - m)
        denom = jnp.sum(e, axis=-1, keepdims=True)
        p = (e * pl.reciprocal(denom, approx=True)).astype(dt)     # (N, N)
        # attn_drop: rate 0.0 -> identity

        obuf_ref[:, hh * hd:(hh + 1) * hd] = jnp.dot(
            p, v, preferred_element_type=jnp.float32).astype(dt)   # (N, hd)

    # Group-level output projection (contraction depth Ghd), accumulated into
    # the lane-dense (N, C) f32 scratch. Concat-free.
    acc_ref[...] += jnp.dot(obuf_ref[...], wproj_ref[g],
                            preferred_element_type=jnp.float32)

    @pl.when(g == pl.num_programs(1) - 1)
    def _():
        # proj_drop: rate 0.0 -> identity
        o_ref[0] = (acc_ref[...] + bproj_ref[...]).astype(o_ref.dtype)


def attention_pallas(x, params):
    """x: (B, N, C); params: output of prepare_attention_params."""
    B, N, C = x.shape
    G = params["group_size"]
    hd = params["head_dim"]
    NG = params["num_groups"]
    Ghd = G * hd
    wqkv_g, bqkv_g = params["wqkv"], params["bqkv"]
    wproj_g, bproj = params["wproj"], params["bproj"]

    kernel = functools.partial(_attention_kernel, group_size=G, head_dim=hd)

    # Explicit VMEM budget: resident weights (double-buffer-accounted) +
    # streamed x/out blocks + scratches, floored at the v5e default (16 MiB)
    # and capped well under v7x's 64 MiB physical VMEM.
    def _bytes(a):
        return int(a.size) * jnp.dtype(a.dtype).itemsize
    resident = _bytes(wqkv_g) + _bytes(bqkv_g) + _bytes(wproj_g) + _bytes(bproj)
    streamed = 2 * 2 * N * C * jnp.dtype(x.dtype).itemsize      # x + out, dbl-buf
    scratch = N * Ghd * jnp.dtype(x.dtype).itemsize + N * C * 4
    est = 2 * resident + streamed + scratch
    vmem_limit = int(min(max(2 * est + (1 << 20), 16 << 20), 56 << 20))

    return pl.pallas_call(
        kernel,
        out_shape=jax.ShapeDtypeStruct((B, N, C), x.dtype),
        grid_spec=pltpu.PrefetchScalarGridSpec(
            num_scalar_prefetch=0,
            grid=(B, NG),                                   # group axis = reduction
            in_specs=[
                pl.BlockSpec((1, N, C), lambda b, g: (b, 0, 0)),        # x
                pl.BlockSpec((NG, C, 3 * Ghd), lambda b, g: (0, 0, 0)),  # Wqkv (resident)
                pl.BlockSpec((NG, 1, 3 * Ghd), lambda b, g: (0, 0, 0)),  # bqkv (resident)
                pl.BlockSpec((NG, Ghd, C), lambda b, g: (0, 0, 0)),      # Wproj (resident)
                pl.BlockSpec((1, C), lambda b, g: (0, 0)),               # bproj (resident)
            ],
            out_specs=pl.BlockSpec((1, N, C), lambda b, g: (b, 0, 0)),
            scratch_shapes=[
                pltpu.VMEM((N, Ghd), x.dtype),       # per-group attention output
                pltpu.VMEM((N, C), jnp.float32),     # projection accumulator
            ],
        ),
        compiler_params=pltpu.CompilerParams(
            dimension_semantics=("parallel", "arbitrary"),
            vmem_limit_bytes=vmem_limit),
    )(x, wqkv_g, bqkv_g, wproj_g, bproj)


def attention_reference(x, wqkv, bqkv, wproj, bproj, *, num_heads):
    """Plain-JAX reference replicating the PyTorch forward exactly."""
    B, N, C = x.shape
    head_dim = C // num_heads
    scale = head_dim ** (-0.5)
    qkv = jnp.einsum("bnc,cd->bnd", x, wqkv) + bqkv[0]               # (B, N, 3C)
    qkv = qkv.reshape(B, N, 3, num_heads, head_dim).transpose(2, 0, 3, 1, 4)
    q, k, v = qkv[0], qkv[1], qkv[2]                                  # (B, H, N, hd)
    attn = jnp.einsum("bhnd,bhmd->bhnm", q, k) * scale
    attn = jax.nn.softmax(attn, axis=-1)
    o = jnp.einsum("bhnm,bhmd->bhnd", attn, v)
    o = o.transpose(0, 2, 1, 3).reshape(B, N, C)
    return jnp.einsum("bnc,cd->bnd", o, wproj) + bproj[0]


if __name__ == "__main__":
    # Small shapes consistent with the module: B=2, N=8 tokens, C=32 dim, 8 heads.
    B, N, C = 2, 8, 32
    num_heads = 8

    key = jax.random.PRNGKey(0)
    kx, kw1, kb1, kw2, kb2 = jax.random.split(key, 5)

    x = jax.random.normal(kx, (B, N, C), dtype=jnp.float32)
    # Deterministic parameter init (synthetic; no checkpoint loading).
    wqkv = jax.random.normal(kw1, (C, 3 * C), dtype=jnp.float32) * 0.05
    bqkv = jax.random.normal(kb1, (1, 3 * C), dtype=jnp.float32) * 0.01
    wproj = jax.random.normal(kw2, (C, C), dtype=jnp.float32) * 0.05
    bproj = jax.random.normal(kb2, (1, C), dtype=jnp.float32) * 0.01

    # One-time weight prep (hoisted out of the forward path).
    params = prepare_attention_params(wqkv, bqkv, wproj, bproj,
                                      num_heads=num_heads)

    out = attention_pallas(x, params)
    out = jax.block_until_ready(out)

    ref = attention_reference(x, wqkv, bqkv, wproj, bproj, num_heads=num_heads)
    assert out.shape == (B, N, C)
    # Tolerance slightly loosened vs. 1e-4 because of the approx reciprocal
    # in the softmax denominator (documented precision tradeoff).
    assert jnp.allclose(out, ref, atol=2e-3, rtol=2e-3), "mismatch vs reference"

    print("KERNEL_OK")
</pallas_src>

<mosaic_0001>
module attributes {stable_mosaic.version = 11 : i64} {
  func.func @_attention_kernel(%arg0: i32, %arg1: i32, %arg2: memref<1x8x32xf32, #tpu.memory_space<vmem>>, %arg3: memref<1x32x96xf32, #tpu.memory_space<vmem>>, %arg4: memref<1x1x96xf32, #tpu.memory_space<vmem>>, %arg5: memref<1x32x32xf32, #tpu.memory_space<vmem>>, %arg6: memref<1x32xf32, #tpu.memory_space<vmem>>, %arg7: memref<1x8x32xf32, #tpu.memory_space<vmem>>, %arg8: memref<8x32xf32, #tpu.memory_space<vmem>>, %arg9: memref<8x32xf32, #tpu.memory_space<vmem>>) attributes {dimension_semantics = [#tpu.dimension_semantics<parallel>, #tpu.dimension_semantics<arbitrary>], iteration_bounds = array<i64: 2, 1>, scalar_prefetch = 0 : i64, scratch_operands = 2 : i64, tpu.core_type = #tpu.core_type<tc>, window_params = [{transform_indices = @transform_0, window_bounds = array<i64: 1, 8, 32>}, {pipeline_mode = #tpu.pipeline_mode<synchronous>, transform_indices = @transform_1, window_bounds = array<i64: 1, 32, 96>}, {pipeline_mode = #tpu.pipeline_mode<synchronous>, transform_indices = @transform_2, window_bounds = array<i64: 1, 1, 96>}, {pipeline_mode = #tpu.pipeline_mode<synchronous>, transform_indices = @transform_3, window_bounds = array<i64: 1, 32, 32>}, {pipeline_mode = #tpu.pipeline_mode<synchronous>, transform_indices = @transform_4, window_bounds = array<i64: 1, 32>}, {transform_indices = @transform_5, window_bounds = array<i64: 1, 8, 32>}]} {
    %c0_i32 = arith.constant 0 : i32
    %0 = arith.cmpi eq, %arg1, %c0_i32 : i32
    %1 = arith.extui %0 : i1 to i32
    %c0_i32_0 = arith.constant 0 : i32
    %2 = arith.cmpi ne, %1, %c0_i32_0 : i32
    scf.if %2 {
      %cst_59 = arith.constant 0.000000e+00 : f32
      %153 = vector.broadcast %cst_59 : f32 to vector<8x32xf32>
      %c0_60 = arith.constant 0 : index
      %c0_61 = arith.constant 0 : index
      %154 = vector.load %arg9[%c0_60, %c0_61] : memref<8x32xf32, #tpu.memory_space<vmem>>, vector<8x32xf32>
      tpu.vector_store %arg9[%c0_60, %c0_61], %153 {strides = array<i32>} : memref<8x32xf32, #tpu.memory_space<vmem>>, vector<8x32xf32>,
    } else {
    }
    %c0 = arith.constant 0 : index
    %c0_1 = arith.constant 0 : index
    %c0_2 = arith.constant 0 : index
    %3 = vector.load %arg2[%c0, %c0_1, %c0_2] : memref<1x8x32xf32, #tpu.memory_space<vmem>>, vector<1x8x32xf32>
    %4 = vector.shape_cast %3 : vector<1x8x32xf32> to vector<8x32xf32>
    %5 = arith.index_cast %arg1 : i32 to index
    %c0_3 = arith.constant 0 : index
    %c0_4 = arith.constant 0 : index
    %6 = vector.load %arg3[%5, %c0_3, %c0_4] : memref<1x32x96xf32, #tpu.memory_space<vmem>>, vector<1x32x96xf32>
    %7 = vector.shape_cast %6 : vector<1x32x96xf32> to vector<32x96xf32>
    %cst = arith.constant dense<0.000000e+00> : vector<8x96xf32>
    %8 = tpu.matmul %4, %7, %cst {dimension_numbers = #tpu.dot_dimension_numbers<[1], [0], [0], [1], [0, 0, 1, 1], [], []>} : vector<8x32xf32>, vector<32x96xf32>, vector<8x96xf32> -> vector<8x96xf32>
    %9 = arith.index_cast %arg1 : i32 to index
    %c0_5 = arith.constant 0 : index
    %c0_6 = arith.constant 0 : index
    %10 = vector.load %arg4[%9, %c0_5, %c0_6] : memref<1x1x96xf32, #tpu.memory_space<vmem>>, vector<1x1x96xf32>
    %11 = vector.shape_cast %10 : vector<1x1x96xf32> to vector<1x96xf32>
    %12 = vector.broadcast %11 : vector<1x96xf32> to vector<8x96xf32>
    %13 = arith.addf %8, %12 : vector<8x96xf32>
    %14 = vector.extract_strided_slice %13 {offsets = [0, 0], sizes = [8, 4], strides = [1, 1]} : vector<8x96xf32> to vector<8x4xf32>
    %15 = vector.extract_strided_slice %13 {offsets = [0, 32], sizes = [8, 4], strides = [1, 1]} : vector<8x96xf32> to vector<8x4xf32>
    %16 = vector.extract_strided_slice %13 {offsets = [0, 64], sizes = [8, 4], strides = [1, 1]} : vector<8x96xf32> to vector<8x4xf32>
    %cst_7 = arith.constant dense<0.000000e+00> : vector<8x8xf32>
    %17 = tpu.matmul %14, %15, %cst_7 {dimension_numbers = #tpu.dot_dimension_numbers<[1], [1], [0], [0], [0, 0, 1, 0], [], []>} : vector<8x4xf32>, vector<8x4xf32>, vector<8x8xf32> -> vector<8x8xf32>
    %cst_8 = arith.constant dense<0xFF800000> : vector<8xf32>
    %18 = vector.multi_reduction <maximumf>, %17, %cst_8 [1] : vector<8x8xf32> to vector<8xf32>
    %19 = vector.shape_cast %18 : vector<8xf32> to vector<8x1xf32>
    %20 = vector.broadcast %19 : vector<8x1xf32> to vector<8x8xf32>
    %21 = arith.subf %17, %20 : vector<8x8xf32>
    %22 = math.exp %21 : vector<8x8xf32>
    %cst_9 = arith.constant dense<0.000000e+00> : vector<8xf32>
    %23 = vector.multi_reduction <add>, %22, %cst_9 [1] : vector<8x8xf32> to vector<8xf32>
    %24 = vector.shape_cast %23 : vector<8xf32> to vector<8x1xf32>
    %25 = tpu.reciprocal %24 {approx = true} : vector<8x1xf32> -> vector<8x1xf32>
    %26 = vector.broadcast %25 : vector<8x1xf32> to vector<8x8xf32>
    %27 = arith.mulf %22, %26 : vector<8x8xf32>
    %cst_10 = arith.constant dense<0.000000e+00> : vector<8x4xf32>
    %28 = tpu.matmul %27, %16, %cst_10 {dimension_numbers = #tpu.dot_dimension_numbers<[1], [0], [0], [1], [0, 0, 1, 1], [], []>} : vector<8x8xf32>, vector<8x4xf32>, vector<8x4xf32> -> vector<8x4xf32>
    %c0_11 = arith.constant 0 : index
    %c0_12 = arith.constant 0 : index
    %29 = vector.load %arg8[%c0_11, %c0_12] : memref<8x32xf32, #tpu.memory_space<vmem>>, vector<8x4xf32>
    tpu.vector_store %arg8[%c0_11, %c0_12], %28 {strides = array<i32>} : memref<8x32xf32, #tpu.memory_space<vmem>>, vector<8x4xf32>,
    %30 = vector.extract_strided_slice %13 {offsets = [0, 4], sizes = [8, 4], strides = [1, 1]} : vector<8x96xf32> to vector<8x4xf32>
    %31 = vector.extract_strided_slice %13 {offsets = [0, 36], sizes = [8, 4], strides = [1, 1]} : vector<8x96xf32> to vector<8x4xf32>
    %32 = vector.extract_strided_slice %13 {offsets = [0, 68], sizes = [8, 4], strides = [1, 1]} : vector<8x96xf32> to vector<8x4xf32>
    %cst_13 = arith.constant dense<0.000000e+00> : vector<8x8xf32>
    %33 = tpu.matmul %30, %31, %cst_13 {dimension_numbers = #tpu.dot_dimension_numbers<[1], [1], [0], [0], [0, 0, 1, 0], [], []>} : vector<8x4xf32>, vector<8x4xf32>, vector<8x8xf32> -> vector<8x8xf32>
    %cst_14 = arith.constant dense<0xFF800000> : vector<8xf32>
    %34 = vector.multi_reduction <maximumf>, %33, %cst_14 [1] : vector<8x8xf32> to vector<8xf32>
    %35 = vector.shape_cast %34 : vector<8xf32> to vector<8x1xf32>
    %36 = vector.broadcast %35 : vector<8x1xf32> to vector<8x8xf32>
    %37 = arith.subf %33, %36 : vector<8x8xf32>
    %38 = math.exp %37 : vector<8x8xf32>
    %cst_15 = arith.constant dense<0.000000e+00> : vector<8xf32>
    %39 = vector.multi_reduction <add>, %38, %cst_15 [1] : vector<8x8xf32> to vector<8xf32>
    %40 = vector.shape_cast %39 : vector<8xf32> to vector<8x1xf32>
    %41 = tpu.reciprocal %40 {approx = true} : vector<8x1xf32> -> vector<8x1xf32>
    %42 = vector.broadcast %41 : vector<8x1xf32> to vector<8x8xf32>
    %43 = arith.mulf %38, %42 : vector<8x8xf32>
    %cst_16 = arith.constant dense<0.000000e+00> : vector<8x4xf32>
    %44 = tpu.matmul %43, %32, %cst_16 {dimension_numbers = #tpu.dot_dimension_numbers<[1], [0], [0], [1], [0, 0, 1, 1], [], []>} : vector<8x8xf32>, vector<8x4xf32>, vector<8x4xf32> -> vector<8x4xf32>
    %c0_17 = arith.constant 0 : index
    %c4 = arith.constant 4 : index
    %45 = vector.load %arg8[%c0_17, %c4] : memref<8x32xf32, #tpu.memory_space<vmem>>, vector<8x4xf32>
    tpu.vector_store %arg8[%c0_17, %c4], %44 {strides = array<i32>} : memref<8x32xf32, #tpu.memory_space<vmem>>, vector<8x4xf32>,
    %46 = vector.extract_strided_slice %13 {offsets = [0, 8], sizes = [8, 4], strides = [1, 1]} : vector<8x96xf32> to vector<8x4xf32>
    %47 = vector.extract_strided_slice %13 {offsets = [0, 40], sizes = [8, 4], strides = [1, 1]} : vector<8x96xf32> to vector<8x4xf32>
    %48 = vector.extract_strided_slice %13 {offsets = [0, 72], sizes = [8, 4], strides = [1, 1]} : vector<8x96xf32> to vector<8x4xf32>
    %cst_18 = arith.constant dense<0.000000e+00> : vector<8x8xf32>
    %49 = tpu.matmul %46, %47, %cst_18 {dimension_numbers = #tpu.dot_dimension_numbers<[1], [1], [0], [0], [0, 0, 1, 0], [], []>} : vector<8x4xf32>, vector<8x4xf32>, vector<8x8xf32> -> vector<8x8xf32>
    %cst_19 = arith.constant dense<0xFF800000> : vector<8xf32>
    %50 = vector.multi_reduction <maximumf>, %49, %cst_19 [1] : vector<8x8xf32> to vector<8xf32>
    %51 = vector.shape_cast %50 : vector<8xf32> to vector<8x1xf32>
    %52 = vector.broadcast %51 : vector<8x1xf32> to vector<8x8xf32>
    %53 = arith.subf %49, %52 : vector<8x8xf32>
    %54 = math.exp %53 : vector<8x8xf32>
    %cst_20 = arith.constant dense<0.000000e+00> : vector<8xf32>
    %55 = vector.multi_reduction <add>, %54, %cst_20 [1] : vector<8x8xf32> to vector<8xf32>
    %56 = vector.shape_cast %55 : vector<8xf32> to vector<8x1xf32>
    %57 = tpu.reciprocal %56 {approx = true} : vector<8x1xf32> -> vector<8x1xf32>
    %58 = vector.broadcast %57 : vector<8x1xf32> to vector<8x8xf32>
    %59 = arith.mulf %54, %58 : vector<8x8xf32>
    %cst_21 = arith.constant dense<0.000000e+00> : vector<8x4xf32>
    %60 = tpu.matmul %59, %48, %cst_21 {dimension_numbers = #tpu.dot_dimension_numbers<[1], [0], [0], [1], [0, 0, 1, 1], [], []>} : vector<8x8xf32>, vector<8x4xf32>, vector<8x4xf32> -> vector<8x4xf32>
    %c0_22 = arith.constant 0 : index
    %c8 = arith.constant 8 : index
    %61 = vector.load %arg8[%c0_22, %c8] : memref<8x32xf32, #tpu.memory_space<vmem>>, vector<8x4xf32>
    tpu.vector_store %arg8[%c0_22, %c8], %60 {strides = array<i32>} : memref<8x32xf32, #tpu.memory_space<vmem>>, vector<8x4xf32>,
    %62 = vector.extract_strided_slice %13 {offsets = [0, 12], sizes = [8, 4], strides = [1, 1]} : vector<8x96xf32> to vector<8x4xf32>
    %63 = vector.extract_strided_slice %13 {offsets = [0, 44], sizes = [8, 4], strides = [1, 1]} : vector<8x96xf32> to vector<8x4xf32>
    %64 = vector.extract_strided_slice %13 {offsets = [0, 76], sizes = [8, 4], strides = [1, 1]} : vector<8x96xf32> to vector<8x4xf32>
    %cst_23 = arith.constant dense<0.000000e+00> : vector<8x8xf32>
    %65 = tpu.matmul %62, %63, %cst_23 {dimension_numbers = #tpu.dot_dimension_numbers<[1], [1], [0], [0], [0, 0, 1, 0], [], []>} : vector<8x4xf32>, vector<8x4xf32>, vector<8x8xf32> -> vector<8x8xf32>
    %cst_24 = arith.constant dense<0xFF800000> : vector<8xf32>
    %66 = vector.multi_reduction <maximumf>, %65, %cst_24 [1] : vector<8x8xf32> to vector<8xf32>
    %67 = vector.shape_cast %66 : vector<8xf32> to vector<8x1xf32>
    %68 = vector.broadcast %67 : vector<8x1xf32> to vector<8x8xf32>
    %69 = arith.subf %65, %68 : vector<8x8xf32>
    %70 = math.exp %69 : vector<8x8xf32>
    %cst_25 = arith.constant dense<0.000000e+00> : vector<8xf32>
    %71 = vector.multi_reduction <add>, %70, %cst_25 [1] : vector<8x8xf32> to vector<8xf32>
    %72 = vector.shape_cast %71 : vector<8xf32> to vector<8x1xf32>
    %73 = tpu.reciprocal %72 {approx = true} : vector<8x1xf32> -> vector<8x1xf32>
    %74 = vector.broadcast %73 : vector<8x1xf32> to vector<8x8xf32>
    %75 = arith.mulf %70, %74 : vector<8x8xf32>
    %cst_26 = arith.constant dense<0.000000e+00> : vector<8x4xf32>
    %76 = tpu.matmul %75, %64, %cst_26 {dimension_numbers = #tpu.dot_dimension_numbers<[1], [0], [0], [1], [0, 0, 1, 1], [], []>} : vector<8x8xf32>, vector<8x4xf32>, vector<8x4xf32> -> vector<8x4xf32>
    %c0_27 = arith.constant 0 : index
    %c12 = arith.constant 12 : index
    %77 = vector.load %arg8[%c0_27, %c12] : memref<8x32xf32, #tpu.memory_space<vmem>>, vector<8x4xf32>
    tpu.vector_store %arg8[%c0_27, %c12], %76 {strides = array<i32>} : memref<8x32xf32, #tpu.memory_space<vmem>>, vector<8x4xf32>,
    %78 = vector.extract_strided_slice %13 {offsets = [0, 16], sizes = [8, 4], strides = [1, 1]} : vector<8x96xf32> to vector<8x4xf32>
    %79 = vector.extract_strided_slice %13 {offsets = [0, 48], sizes = [8, 4], strides = [1, 1]} : vector<8x96xf32> to vector<8x4xf32>
    %80 = vector.extract_strided_slice %13 {offsets = [0, 80], sizes = [8, 4], strides = [1, 1]} : vector<8x96xf32> to vector<8x4xf32>
    %cst_28 = arith.constant dense<0.000000e+00> : vector<8x8xf32>
    %81 = tpu.matmul %78, %79, %cst_28 {dimension_numbers = #tpu.dot_dimension_numbers<[1], [1], [0], [0], [0, 0, 1, 0], [], []>} : vector<8x4xf32>, vector<8x4xf32>, vector<8x8xf32> -> vector<8x8xf32>
    %cst_29 = arith.constant dense<0xFF800000> : vector<8xf32>
    %82 = vector.multi_reduction <maximumf>, %81, %cst_29 [1] : vector<8x8xf32> to vector<8xf32>
    %83 = vector.shape_cast %82 : vector<8xf32> to vector<8x1xf32>
    %84 = vector.broadcast %83 : vector<8x1xf32> to vector<8x8xf32>
    %85 = arith.subf %81, %84 : vector<8x8xf32>
    %86 = math.exp %85 : vector<8x8xf32>
    %cst_30 = arith.constant dense<0.000000e+00> : vector<8xf32>
    %87 = vector.multi_reduction <add>, %86, %cst_30 [1] : vector<8x8xf32> to vector<8xf32>
    %88 = vector.shape_cast %87 : vector<8xf32> to vector<8x1xf32>
    %89 = tpu.reciprocal %88 {approx = true} : vector<8x1xf32> -> vector<8x1xf32>
    %90 = vector.broadcast %89 : vector<8x1xf32> to vector<8x8xf32>
    %91 = arith.mulf %86, %90 : vector<8x8xf32>
    %cst_31 = arith.constant dense<0.000000e+00> : vector<8x4xf32>
    %92 = tpu.matmul %91, %80, %cst_31 {dimension_numbers = #tpu.dot_dimension_numbers<[1], [0], [0], [1], [0, 0, 1, 1], [], []>} : vector<8x8xf32>, vector<8x4xf32>, vector<8x4xf32> -> vector<8x4xf32>
    %c0_32 = arith.constant 0 : index
    %c16 = arith.constant 16 : index
    %93 = vector.load %arg8[%c0_32, %c16] : memref<8x32xf32, #tpu.memory_space<vmem>>, vector<8x4xf32>
    tpu.vector_store %arg8[%c0_32, %c16], %92 {strides = array<i32>} : memref<8x32xf32, #tpu.memory_space<vmem>>, vector<8x4xf32>,
    %94 = vector.extract_strided_slice %13 {offsets = [0, 20], sizes = [8, 4], strides = [1, 1]} : vector<8x96xf32> to vector<8x4xf32>
    %95 = vector.extract_strided_slice %13 {offsets = [0, 52], sizes = [8, 4], strides = [1, 1]} : vector<8x96xf32> to vector<8x4xf32>
    %96 = vector.extract_strided_slice %13 {offsets = [0, 84], sizes = [8, 4], strides = [1, 1]} : vector<8x96xf32> to vector<8x4xf32>
    %cst_33 = arith.constant dense<0.000000e+00> : vector<8x8xf32>
    %97 = tpu.matmul %94, %95, %cst_33 {dimension_numbers = #tpu.dot_dimension_numbers<[1], [1], [0], [0], [0, 0, 1, 0], [], []>} : vector<8x4xf32>, vector<8x4xf32>, vector<8x8xf32> -> vector<8x8xf32>
    %cst_34 = arith.constant dense<0xFF800000> : vector<8xf32>
    %98 = vector.multi_reduction <maximumf>, %97, %cst_34 [1] : vector<8x8xf32> to vector<8xf32>
    %99 = vector.shape_cast %98 : vector<8xf32> to vector<8x1xf32>
    %100 = vector.broadcast %99 : vector<8x1xf32> to vector<8x8xf32>
    %101 = arith.subf %97, %100 : vector<8x8xf32>
    %102 = math.exp %101 : vector<8x8xf32>
    %cst_35 = arith.constant dense<0.000000e+00> : vector<8xf32>
    %103 = vector.multi_reduction <add>, %102, %cst_35 [1] : vector<8x8xf32> to vector<8xf32>
    %104 = vector.shape_cast %103 : vector<8xf32> to vector<8x1xf32>
    %105 = tpu.reciprocal %104 {approx = true} : vector<8x1xf32> -> vector<8x1xf32>
    %106 = vector.broadcast %105 : vector<8x1xf32> to vector<8x8xf32>
    %107 = arith.mulf %102, %106 : vector<8x8xf32>
    %cst_36 = arith.constant dense<0.000000e+00> : vector<8x4xf32>
    %108 = tpu.matmul %107, %96, %cst_36 {dimension_numbers = #tpu.dot_dimension_numbers<[1], [0], [0], [1], [0, 0, 1, 1], [], []>} : vector<8x8xf32>, vector<8x4xf32>, vector<8x4xf32> -> vector<8x4xf32>
    %c0_37 = arith.constant 0 : index
    %c20 = arith.constant 20 : index
    %109 = vector.load %arg8[%c0_37, %c20] : memref<8x32xf32, #tpu.memory_space<vmem>>, vector<8x4xf32>
    tpu.vector_store %arg8[%c0_37, %c20], %108 {strides = array<i32>} : memref<8x32xf32, #tpu.memory_space<vmem>>, vector<8x4xf32>,
    %110 = vector.extract_strided_slice %13 {offsets = [0, 24], sizes = [8, 4], strides = [1, 1]} : vector<8x96xf32> to vector<8x4xf32>
    %111 = vector.extract_strided_slice %13 {offsets = [0, 56], sizes = [8, 4], strides = [1, 1]} : vector<8x96xf32> to vector<8x4xf32>
    %112 = vector.extract_strided_slice %13 {offsets = [0, 88], sizes = [8, 4], strides = [1, 1]} : vector<8x96xf32> to vector<8x4xf32>
    %cst_38 = arith.constant dense<0.000000e+00> : vector<8x8xf32>
    %113 = tpu.matmul %110, %111, %cst_38 {dimension_numbers = #tpu.dot_dimension_numbers<[1], [1], [0], [0], [0, 0, 1, 0], [], []>} : vector<8x4xf32>, vector<8x4xf32>, vector<8x8xf32> -> vector<8x8xf32>
    %cst_39 = arith.constant dense<0xFF800000> : vector<8xf32>
    %114 = vector.multi_reduction <maximumf>, %113, %cst_39 [1] : vector<8x8xf32> to vector<8xf32>
    %115 = vector.shape_cast %114 : vector<8xf32> to vector<8x1xf32>
    %116 = vector.broadcast %115 : vector<8x1xf32> to vector<8x8xf32>
    %117 = arith.subf %113, %116 : vector<8x8xf32>
    %118 = math.exp %117 : vector<8x8xf32>
    %cst_40 = arith.constant dense<0.000000e+00> : vector<8xf32>
    %119 = vector.multi_reduction <add>, %118, %cst_40 [1] : vector<8x8xf32> to vector<8xf32>
    %120 = vector.shape_cast %119 : vector<8xf32> to vector<8x1xf32>
    %121 = tpu.reciprocal %120 {approx = true} : vector<8x1xf32> -> vector<8x1xf32>
    %122 = vector.broadcast %121 : vector<8x1xf32> to vector<8x8xf32>
    %123 = arith.mulf %118, %122 : vector<8x8xf32>
    %cst_41 = arith.constant dense<0.000000e+00> : vector<8x4xf32>
    %124 = tpu.matmul %123, %112, %cst_41 {dimension_numbers = #tpu.dot_dimension_numbers<[1], [0], [0], [1], [0, 0, 1, 1], [], []>} : vector<8x8xf32>, vector<8x4xf32>, vector<8x4xf32> -> vector<8x4xf32>
    %c0_42 = arith.constant 0 : index
    %c24 = arith.constant 24 : index
    %125 = vector.load %arg8[%c0_42, %c24] : memref<8x32xf32, #tpu.memory_space<vmem>>, vector<8x4xf32>
    tpu.vector_store %arg8[%c0_42, %c24], %124 {strides = array<i32>} : memref<8x32xf32, #tpu.memory_space<vmem>>, vector<8x4xf32>,
    %126 = vector.extract_strided_slice %13 {offsets = [0, 28], sizes = [8, 4], strides = [1, 1]} : vector<8x96xf32> to vector<8x4xf32>
    %127 = vector.extract_strided_slice %13 {offsets = [0, 60], sizes = [8, 4], strides = [1, 1]} : vector<8x96xf32> to vector<8x4xf32>
    %128 = vector.extract_strided_slice %13 {offsets = [0, 92], sizes = [8, 4], strides = [1, 1]} : vector<8x96xf32> to vector<8x4xf32>
    %cst_43 = arith.constant dense<0.000000e+00> : vector<8x8xf32>
    %129 = tpu.matmul %126, %127, %cst_43 {dimension_numbers = #tpu.dot_dimension_numbers<[1], [1], [0], [0], [0, 0, 1, 0], [], []>} : vector<8x4xf32>, vector<8x4xf32>, vector<8x8xf32> -> vector<8x8xf32>
    %cst_44 = arith.constant dense<0xFF800000> : vector<8xf32>
    %130 = vector.multi_reduction <maximumf>, %129, %cst_44 [1] : vector<8x8xf32> to vector<8xf32>
    %131 = vector.shape_cast %130 : vector<8xf32> to vector<8x1xf32>
    %132 = vector.broadcast %131 : vector<8x1xf32> to vector<8x8xf32>
    %133 = arith.subf %129, %132 : vector<8x8xf32>
    %134 = math.exp %133 : vector<8x8xf32>
    %cst_45 = arith.constant dense<0.000000e+00> : vector<8xf32>
    %135 = vector.multi_reduction <add>, %134, %cst_45 [1] : vector<8x8xf32> to vector<8xf32>
    %136 = vector.shape_cast %135 : vector<8xf32> to vector<8x1xf32>
    %137 = tpu.reciprocal %136 {approx = true} : vector<8x1xf32> -> vector<8x1xf32>
    %138 = vector.broadcast %137 : vector<8x1xf32> to vector<8x8xf32>
    %139 = arith.mulf %134, %138 : vector<8x8xf32>
    %cst_46 = arith.constant dense<0.000000e+00> : vector<8x4xf32>
    %140 = tpu.matmul %139, %128, %cst_46 {dimension_numbers = #tpu.dot_dimension_numbers<[1], [0], [0], [1], [0, 0, 1, 1], [], []>} : vector<8x8xf32>, vector<8x4xf32>, vector<8x4xf32> -> vector<8x4xf32>
    %c0_47 = arith.constant 0 : index
    %c28 = arith.constant 28 : index
    %141 = vector.load %arg8[%c0_47, %c28] : memref<8x32xf32, #tpu.memory_space<vmem>>, vector<8x4xf32>
    tpu.vector_store %arg8[%c0_47, %c28], %140 {strides = array<i32>} : memref<8x32xf32, #tpu.memory_space<vmem>>, vector<8x4xf32>,
    %c0_48 = arith.constant 0 : index
    %c0_49 = arith.constant 0 : index
    %142 = vector.load %arg9[%c0_48, %c0_49] : memref<8x32xf32, #tpu.memory_space<vmem>>, vector<8x32xf32>
    %c0_50 = arith.constant 0 : index
    %c0_51 = arith.constant 0 : index
    %143 = vector.load %arg8[%c0_50, %c0_51] : memref<8x32xf32, #tpu.memory_space<vmem>>, vector<8x32xf32>
    %144 = arith.index_cast %arg1 : i32 to index
    %c0_52 = arith.constant 0 : index
    %c0_53 = arith.constant 0 : index
    %145 = vector.load %arg5[%144, %c0_52, %c0_53] : memref<1x32x32xf32, #tpu.memory_space<vmem>>, vector<1x32x32xf32>
    %146 = vector.shape_cast %145 : vector<1x32x32xf32> to vector<32x32xf32>
    %cst_54 = arith.constant dense<0.000000e+00> : vector<8x32xf32>
    %147 = tpu.matmul %143, %146, %cst_54 {dimension_numbers = #tpu.dot_dimension_numbers<[1], [0], [0], [1], [0, 0, 1, 1], [], []>} : vector<8x32xf32>, vector<32x32xf32>, vector<8x32xf32> -> vector<8x32xf32>
    %148 = arith.addf %142, %147 : vector<8x32xf32>
    %c0_55 = arith.constant 0 : index
    %c0_56 = arith.constant 0 : index
    %149 = vector.load %arg9[%c0_55, %c0_56] : memref<8x32xf32, #tpu.memory_space<vmem>>, vector<8x32xf32>
    tpu.vector_store %arg9[%c0_55, %c0_56], %148 {strides = array<i32>} : memref<8x32xf32, #tpu.memory_space<vmem>>, vector<8x32xf32>,
    %c0_i32_57 = arith.constant 0 : i32
    %150 = arith.cmpi eq, %arg1, %c0_i32_57 : i32
    %151 = arith.extui %150 : i1 to i32
    %c0_i32_58 = arith.constant 0 : i32
    %152 = arith.cmpi ne, %151, %c0_i32_58 : i32
    scf.if %152 {
      %c0_59 = arith.constant 0 : index
      %c0_60 = arith.constant 0 : index
      %153 = vector.load %arg9[%c0_59, %c0_60] : memref<8x32xf32, #tpu.memory_space<vmem>>, vector<8x32xf32>
      %c0_61 = arith.constant 0 : index
      %c0_62 = arith.constant 0 : index
      %154 = vector.load %arg6[%c0_61, %c0_62] : memref<1x32xf32, #tpu.memory_space<vmem>>, vector<1x32xf32>
      %155 = vector.broadcast %154 : vector<1x32xf32> to vector<8x32xf32>
      %156 = arith.addf %153, %155 : vector<8x32xf32>
      %c0_63 = arith.constant 0 : index
      %c0_64 = arith.constant 0 : index
      %c0_65 = arith.constant 0 : index
      %157 = vector.load %arg7[%c0_63, %c0_64, %c0_65] : memref<1x8x32xf32, #tpu.memory_space<vmem>>, vector<1x8x32xf32>
      %158 = vector.shape_cast %157 : vector<1x8x32xf32> to vector<8x32xf32>
      %159 = vector.shape_cast %156 : vector<8x32xf32> to vector<1x8x32xf32>
      tpu.vector_store %arg7[%c0_63, %c0_64, %c0_65], %159 {strides = array<i32>} : memref<1x8x32xf32, #tpu.memory_space<vmem>>, vector<1x8x32xf32>,
    } else {
    }
    return
  }
  func.func @transform_0(%arg0: i32, %arg1: i32) -> (i32, i32, i32) {
    %c0_i32 = arith.constant 0 : i32
    %c0_i32_0 = arith.constant 0 : i32
    %c0_i32_1 = arith.constant 0 : i32
    return %arg0, %c0_i32, %c0_i32_0 : i32, i32, i32
  }
  func.func @transform_1(%arg0: i32, %arg1: i32) -> (i32, i32, i32) {
    %c0_i32 = arith.constant 0 : i32
    %c0_i32_0 = arith.constant 0 : i32
    %c0_i32_1 = arith.constant 0 : i32
    %c0_i32_2 = arith.constant 0 : i32
    return %c0_i32, %c0_i32_0, %c0_i32_1 : i32, i32, i32
  }
  func.func @transform_2(%arg0: i32, %arg1: i32) -> (i32, i32, i32) {
    %c0_i32 = arith.constant 0 : i32
    %c0_i32_0 = arith.constant 0 : i32
    %c0_i32_1 = arith.constant 0 : i32
    %c0_i32_2 = arith.constant 0 : i32
    return %c0_i32, %c0_i32_0, %c0_i32_1 : i32, i32, i32
  }
  func.func @transform_3(%arg0: i32, %arg1: i32) -> (i32, i32, i32) {
    %c0_i32 = arith.constant 0 : i32
    %c0_i32_0 = arith.constant 0 : i32
    %c0_i32_1 = arith.constant 0 : i32
    %c0_i32_2 = arith.constant 0 : i32
    return %c0_i32, %c0_i32_0, %c0_i32_1 : i32, i32, i32
  }
  func.func @transform_4(%arg0: i32, %arg1: i32) -> (i32, i32) {
    %c0_i32 = arith.constant 0 : i32
    %c0_i32_0 = arith.constant 0 : i32
    %c0_i32_1 = arith.constant 0 : i32
    return %c0_i32, %c0_i32_0 : i32, i32
  }
  func.func @transform_5(%arg0: i32, %arg1: i32) -> (i32, i32, i32) {
    %c0_i32 = arith.constant 0 : i32
    %c0_i32_0 = arith.constant 0 : i32
    %c0_i32_1 = arith.constant 0 : i32
    return %arg0, %c0_i32, %c0_i32_0 : i32, i32, i32
  }
}

</mosaic_0001>

<bundles_post_ra>
// kernel: tpu_custom_call.1
= control target key start
LH: loop header
LB: loop body
LE: loop exit
PB: predicated region body
PF: predicated region fallthrough
CT: control target
= control target key end

     0   :  { %10 = vsyncpa [#allocation5], 0  ;;  %s1731_s0 = inlined_call_operand.hbm [shape: f32[2,8,32], index: 0, kind: input, shape index: {}]   ;;  %s1732_s1 = inlined_call_operand.hbm [shape: f32[1,32,96], index: 1, kind: input, shape index: {}]   ;;  %s1733_s2 = inlined_call_operand.vmem [shape: f32[1,1,96], index: 2, kind: input, shape index: {}]   ;;  %s1734_s3 = inlined_call_operand.hbm [shape: f32[1,32,32], index: 3, kind: input, shape index: {}]   ;;  %s1735_s4 = inlined_call_operand.vmem [shape: f32[1,32], index: 4, kind: input, shape index: {}]   ;;  %s1736_s5 = inlined_call_operand.hbm [shape: f32[2,8,32], index: 5, kind: output, shape index: {}]  }
   0x1   :  { %12 = vsyncpa [#allocation5 + $0x1], 0 }
   0x2   :  { %13 = vsyncpa [#allocation8], 0 }
   0x3   :  { %14 = vsyncpa [#allocation6], 0 }
   0x4   :  { %16 = vsyncpa [#allocation6 + $0x1], 0  ;;  %s1489_s18 = smov 0   ;;  %s1491_s19 = smov 0  }
   0x5   :  { %s1493_s20 = smov 0   ;;  %s1495_s21 = smov 0  }
   0x6   :  { %s1497_s22 = smov 0   ;;  %s1499_s23 = smov 0  }
   0x7 LB: > { %s1053_s24 = sadd.s32 4294967295, %s1422_s23   ;;  %p1055_p0 = scmp.ge.s32.totalorder %s1422_s23, 1  ;;  %s1422_s23 = sphi %s1499_s23, %s22_s23   ;;  %s1418_s22 = sphi %s1497_s22, %s1746_s22   ;;  %s1414_s21 = sphi %s1495_s21, %s1745_s21   ;;  %s1410_s20 = sphi %s1493_s20, %s1744_s20   ;;  %s1406_s19 = sphi %s1491_s19, %s1743_s19   ;;  %s1402_s18 = sphi %s1489_s18, %s1742_s18  }
   0x8   : > { %p1523_p1 = scmp.eq.s32.totalorder %s1053_s24, 0  ;;  %p175_p2 = scmp.lt.s32.totalorder %s1422_s23, 3 }
   0x9   : > { %s186_s28 = sshll.u32 %s1732_s1, 4  ;;  %s1424_s30 = smov [#allocation7]   ;;  %s187_s28 = int_to_ptr.hbm [resolvable:$true] %s186_s28 }
   0xa   : > { %p1531_p3 = pnand %p1055_p0, %p175_p2  ;;  %s188_s6 = sshll.u32 %s1424_s30, 4  ;;  %s189_s6 = int_to_ptr.vmem [resolvable:$true] %s188_s6 }
   0xb   : > { %p1058_p6 = scmp.ge.s32.totalorder %s1422_s23, 2  ;;  %s203_s9 = sshll.u32 %s1734_s3, 4  ;;  %s204_s9 = int_to_ptr.hbm [resolvable:$true] %s203_s9 }
   0xc   : > { %p1108_p4 = pneg %p1531_p3  ;;  %s1425_s10 = smov 128  }
   0xd   : > { %s1426_s11 = smov 8   ;;  %s1427_s12 = smov [#allocation9]  }
   0xe   : > { %p1109_p5 = pnand %p1108_p4, %p1523_p1  ;;  %s205_s13 = sshll.u32 %s1427_s12, 4  ;;  %s206_s13 = int_to_ptr.vmem [resolvable:$true] %s205_s13 }
   0xf   : > { %s34_s14 = sadd.s32 1, %s1418_s22  ;;  %s1054_s15 = sadd.s32 4294967294, %s1422_s23  }
  0x10   : > { %1111 = dma.hbm_to_vmem [thread:$0]  (!%p1109_p5), %s187_s28, 512, %s189_s6, [#allocation8], %s1425_s10, %s1425_s10, %s1426_s11  }
  0x11   : > { %1114 = dma.hbm_to_vmem [thread:$0]  (!%p1109_p5), %s204_s9, 512, %s206_s13, [#allocation8], %s1425_s10, %s1425_s10, %s1426_s11  }
  0x12   : > { %p36_p7 = scmp.ge.s32.totalorder %s34_s14, 2  ;;  %s41_s16 = sadd.s32 1, %s1410_s20 }
  0x13   : > { %p48_p8 = scmp.ne.s32.totalorder %s1410_s20, %s1406_s19  ;;  %p49_p9 = scmp.eq.s32.totalorder %s1422_s23, 0 }
  0x14   : > { %s1748_s14 = smov (%p36_p7, %s34_s14), 0  ;;  %p54_p10 = scmp.ne.s32.totalorder %s1406_s19, %s1402_s18 }
  0x15   : > { %s38_s17 = ssub.s32 %s1418_s22, %s1748_s14  ;;  %p162_p11 = scmp.eq.s32.totalorder %s1053_s24, 1 }
  0x16   : > { %p39_p12 = scmp.eq.s32.totalorder %s38_s17, 0  ;;  %p1559_p13 = por %p1523_p1, %p54_p10 }
  0x17   : > { %p1563_p0 = por %p162_p11, %p48_p8  ;;  %p168_p2 = scmp.eq.s32.totalorder %s1054_s15, 1 }
  0x18   : > { %s1568_s28 = scalar_select %p39_p12, %s1410_s20, %s41_s16  }
  0x19   : > { %p50_p4 = por %p49_p9, %p48_p8  ;;  %p1570_p5 = por %p168_p2, %p54_p10 }
  0x1a   : > { %s222_s6 = sand.u32 1, %s1410_s20   ;;  %s1060_s24 = sshll.u32 %s1418_s22, 3 }
  0x1b   : > { %p1125_p7 = scmp.lt.s32.totalorder %s1422_s23, 2  ;;  %s1059_s7 = sshll.u32 %s222_s6, 3 }
  0x1c   : > { %s230_s10 = scalar_lea.hbm %s1731_s0, %s1060_s24  ;;  %s226_s12 = scalar_lea.vmem [#allocation4], %s1059_s7 }
  0x1d   : > { %s232_s11 = sshll.u32 %s230_s10, 4  ;;  %s234_s13 = sshll.u32 %s226_s12, 4  ;;  %s233_s11 = int_to_ptr.hbm [resolvable:$true] %s232_s11  ;;  %s235_s13 = int_to_ptr.vmem [resolvable:$true] %s234_s13 }
  0x1e   : > { %p1116_p11 = pnand %p1125_p7, %p50_p4  ;;  %s223_s15 = scalar_lea.sflag [#allocation5], %s222_s6 }
  0x1f   : > { %243 = sbr.rel (%p1531_p3) target bundleno = 1142 (0x476), region = 40  ;;  %s1583_s16 = sand.u32 (!%p1531_p3), 1, %s1406_s19  }
  0x20   : > { %1118 = dma.hbm_to_vmem [thread:$0]  (!%p1116_p11), %s233_s11, 128, %s235_s13, %s223_s15  }
  0x21   : > { %s1062_s17 = sshll.u32 (!%p1531_p3), %s1583_s16, 3  ;;  %s246_s24 = scalar_lea.sflag (!%p1531_p3), [#allocation5], %s1583_s16 }
  0x22   : > { %s249_s7 = scalar_lea.vmem (!%p1531_p3), [#allocation4], %s1062_s17 }
  0x24   : > { %1389 = dma.done.wait (%p1559_p13), %s246_s24, 128  }
  0x25   : > { %1391 = vsyncadd (%p1559_p13), %s246_s24, 4294967168 }
  0x26   : > { %1393 = dma.done.wait (%p1523_p1), [#allocation8], 1024  }
  0x27   : > { %1395 = vsyncadd (%p1523_p1), [#allocation8], 4294966272  ;;  %vm291_vm0 = vcmask 261120   ;;  %v1428_v0 = vmov 0.0   ;;  %v299_v1 = vld [vmem:[#allocation7 + $0x18] sm:$0xff]  ;;  %v298_v2 = vld [vmem:[#allocation7 + $0x10] sm:$0xff] }
  0x28   : > { %292 = vst.msk [vmem:[#allocation3] sm:$0xff] %vm291_vm0, %v1428_v0  ;;  %321 = vmatpush.msra.mxu0 %v299_v1  ;;  %v297_v3 = vld [vmem:[#allocation7 + $0x8] sm:$0xff]  ;;  %v296_v4 = vld [vmem:[#allocation7] sm:$0xff]  ;;  %v293_v5 = vld [vmem:[%s249_s7] sm:$0xff]  ;;  %s1429_s25 = smov 84   ;;  %s1430_s6 = smov 124  }
  0x29   : > { %v1212_v6 = vld [vmem:[%s1733_s2] ss:$0 sm:$0xff]  ;;  %s1431_s8 = smov 96   ;;  %s1432_s9 = smov 120   ;;  %vm332_vm1 = vcmask 31744   ;;  %vm357_vm2 = vcmask 64512  }
  0x2a   : > { %322 = vmatpush.msra.mxu0 %v298_v2  ;;  %s1433_s10 = smov 88   ;;  %s1434_s11 = smov 92   ;;  %vm465_vm3 = vcmask 64544   ;;  %vm536_vm4 = vcmask 97344   ;;  %vm607_vm5 = vcmask 130144   ;;  %vm678_vm6 = vcmask 162944  }
  0x2b   : > { %s1435_s12 = smov 76   ;;  %s1436_s13 = smov 80   ;;  %vm749_vm7 = vcmask 195744   ;;  %vm820_vm8 = vcmask 228544   ;;  %vm891_vm9 = vcmask 261344  }
  0x2c   : > { %323 = vmatpush.msra.mxu0 %v297_v3  ;;  %s1437_s15 = smov 116   ;;  %s1438_s24 = smov 72  }
  0x2d   : > { %s1439_s7 = smov 108   ;;  %s1440_s29 = smov 112  }
  0x2e   : > { %324 = vmatpush.msra.mxu0 %v296_v4  ;;  %s1441_s26 = smov 100  }
  0x2f   : > { %1066 = vmatmul.msk.f32.vlgmr.msra.gmra.mxu0 %vm291_vm0, %v293_v5 }
  0xac   : > { %v326_v7 = vpop.f32.mrf.mxu0 }
  0xad   : > { %v1602_v8 = vadd.f32 %v1212_v6, %v326_v7 }
  0xaf   : > { %540 = vrot.lane.b32.xlu2 %v1602_v8, %s1429_s25  ;;  %396 = vrot.lane.b32.xlu1 %v1602_v8, %s1430_s6  ;;  %s1442_s25 = smov 104   ;;  %s1443_s6 = smov 68  }
  0xb0   : > { %330 = vrot.lane.b32.xlu0 %v1602_v8, %s1431_s8  ;;  %s1444_s8 = smov 60  }
  0xb7   : > { %467 = vrot.lane.b32.xlu2 %v1602_v8, %s1432_s9  ;;  %469 = vrot.lane.b32.xlu1 %v1602_v8, %s1433_s10  ;;  %s1445_s9 = smov 64   ;;  %s1446_s10 = smov 56  }
  0xb8   : > { %398 = vrot.lane.b32.xlu0 %v1602_v8, %s1434_s11  ;;  %s1447_s11 = smov 48  }
  0xbf   : > { %682 = vrot.lane.b32.xlu2 %v1602_v8, %s1435_s12  ;;  %611 = vrot.lane.b32.xlu1 %v1602_v8, %s1436_s13  ;;  %s1448_s12 = smov 52   ;;  %s1449_s13 = smov 40  }
  0xc0   : > { %538 = vrot.lane.b32.xlu0 %v1602_v8, %s1437_s15  ;;  %s1450_s15 = smov 36  }
  0xc7   : > { %753 = vrot.lane.b32.xlu2 %v1602_v8, %s1438_s24  ;;  %680 = vrot.lane.b32.xlu1 %v1602_v8, %s1439_s7  ;;  %s1451_s24 = smov 44   ;;  %s1452_s7 = smov 4  }
  0xc8   : > { %609 = vrot.lane.b32.xlu0 %v1602_v8, %s1440_s29  ;;  %s1453_s29 = smov 8  }
  0xcf   : > { %822 = vrot.lane.b32.xlu2 %v1602_v8, %s1441_s26  ;;  %751 = vrot.lane.b32.xlu1 %v1602_v8, %s1442_s25  ;;  %s1454_s26 = smov 12   ;;  %s1455_s25 = smov 16  }
  0xd0   : > { %824 = vrot.lane.b32.xlu0 %v1602_v8, %s1443_s6  ;;  %s1456_s6 = smov 24  }
  0xd7   : > { %435 = vrot.lane.b32.xlu1 %v1602_v8, %s1444_s8  ;;  %s1457_s8 = smov 20  }
  0xd8   : > { %369 = vrot.lane.b32.xlu0 %v1602_v8, %s1445_s9  ;;  %s1458_s9 = smov 28  }
 0x109   : > { %v541_v9 = vpop.permute.xlu2 %540 }
 0x10a   : > { %1076 = vmatpush.xpose.msk.msrb.mxu0 %vm332_vm1, %v541_v9 }
 0x111   : > { %v468_v10 = vpop.permute.xlu2 %467 }
 0x119   : > { %v683_v11 = vpop.permute.xlu2 %682 }
 0x11a   : > { %1082 = vmatpush.xpose.msk.msra.mxu0 %vm332_vm1, %v683_v11 }
 0x121   : > { %v397_v12 = vpop.permute.xlu1 %396  ;;  %v754_v17 = vpop.permute.xlu2 %753 }
 0x122   : > { %v331_v13 = vpop.permute.xlu0 %330 }
 0x123   : > { %1067 = vmatpush.xpose.msk.msra.mxu1 %vm332_vm1, %v331_v13 }
 0x126   : > { %1068 = vmatmul.msk.f32.vlgmr.msra.gmra.mxu1 %vm332_vm1, %v1602_v8 }
 0x129   : > { %v470_v14 = vpop.permute.xlu1 %469  ;;  %v823_v23 = vpop.permute.xlu2 %822 }
 0x12a   : > { %v399_v15 = vpop.permute.xlu0 %398  ;;  %1073 = vmatpush.xpose.msk.msrb.mxu1 %vm332_vm1, %v470_v14 }
 0x12b   : > { %1070 = vmatpush.xpose.msk.msra.mxu3 %vm332_vm1, %v399_v15 }
 0x12e   : > { %1071 = vmatmul.msk.f32.vlgmr.msra.gmra.mxu3 %vm332_vm1, %v397_v12  ;;  %1074 = vmatmul.msk.f32.vlgmr.msrb.gmra.mxu1 %vm332_vm1, %v468_v10 }
 0x131   : > { %v612_v16 = vpop.permute.xlu1 %611 }
 0x132   : > { %v539_v18 = vpop.permute.xlu0 %538  ;;  %1079 = vmatpush.xpose.msk.msra.mxu1 %vm332_vm1, %v612_v16 }
 0x133   : > { %1077 = vmatmul.msk.f32.vlgmr.msrb.gmra.mxu0 %vm332_vm1, %v539_v18 }
 0x136   : > { %1085 = vmatpush.xpose.msk.msrb.mxu1 %vm332_vm1, %v754_v17 }
 0x139   : > { %v681_v19 = vpop.permute.xlu1 %680 }
 0x13a   : > { %v610_v20 = vpop.permute.xlu0 %609 }
 0x13b   : > { %1080 = vmatmul.msk.f32.vlgmr.msra.gmra.mxu1 %vm332_vm1, %v610_v20  ;;  %1083 = vmatmul.msk.f32.vlgmr.msra.gmra.mxu0 %vm332_vm1, %v681_v19 }
 0x141   : > { %v752_v21 = vpop.permute.xlu1 %751 }
 0x142   : > { %v825_v22 = vpop.permute.xlu0 %824 }
 0x143   : > { %1086 = vmatmul.msk.f32.vlgmr.msrb.gmra.mxu1 %vm332_vm1, %v752_v21  ;;  %1088 = vmatpush.xpose.msk.msrb.mxu0 %vm332_vm1, %v825_v22 }
 0x146   : > { %1089 = vmatmul.msk.f32.vlgmr.msrb.gmra.mxu0 %vm332_vm1, %v823_v23 }
 0x149   : > { %v436_v24 = vpop.permute.xlu1 %435 }
 0x14a   : > { %v370_v25 = vpop.permute.xlu0 %369 }
 0x14b   : > { %390 = vmatpush.msra.mxu2 %v370_v25 }
 0x14d   : > { %456 = vmatpush.msrb.mxu2 %v436_v24 }
 0x1a3   : > { %v354_v26 = vpop.f32.mrf.mxu1 }
 0x1a4   : > { %v358_v27 = vsel %vm357_vm2, %v354_v26, -inf }
 0x1a5   : > { %359 = vmax.xlane.f32.xlu0 %v358_v27 }
 0x1ab   : > { %v492_v28 = vpop.f32.mrf.mxu1 }
 0x1ac   : > { %v495_v35 = vsel %vm357_vm2, %v492_v28, -inf }
 0x1b0   : > { %v563_v29 = vpop.f32.mrf.mxu0 }
 0x1b1   : > { %v421_v30 = vpop.f32.mrf.mxu3  ;;  %v566_v31 = vsel %vm357_vm2, %v563_v29, -inf }
 0x1b2   : > { %567 = vmax.xlane.f32.xlu2 %v566_v31  ;;  %v424_v32 = vsel %vm357_vm2, %v421_v30, -inf }
 0x1b3   : > { %425 = vmax.xlane.f32.xlu1 %v424_v32 }
 0x1b8   : > { %v1641_v33 = vpop.f32.mrf.mxu1  ;;  %v705_v34 = vpop.f32.mrf.mxu0 }
 0x1b9   : > { %506 = vrot.lane.b32.xlu0 %v1602_v8, %s1446_s10  ;;  %v708_v36 = vsel %vm357_vm2, %v705_v34, -inf  ;;  %v637_v39 = vsel %vm357_vm2, %v1641_v33, -inf  ;;  %s1093_s10 = sshll.u32 %s1414_s21, 3  ;;  %s936_s21 = scalar_lea.sflag [#allocation6], %s1583_s16 }
 0x1ba   : > { %496 = vmax.xlane.f32.xlu2 %v495_v35 }
 0x1bb   : > { %709 = vmax.xlane.f32.xlu1 %v708_v36 }
 0x1c0   : > { %v776_v37 = vpop.f32.mrf.mxu1 }
 0x1c1   : > { %v779_v38 = vsel %vm357_vm2, %v776_v37, -inf }
 0x1c2   : > { %780 = vmax.xlane.f32.xlu2 %v779_v38 }
 0x1c3   : > { %v847_v40 = vpop.f32.mrf.mxu0 }
 0x1c4   : > { %v850_v41 = vsel %vm357_vm2, %v847_v40, -inf }
 0x1d4   : > { %648 = vrot.lane.b32.xlu1 %v1602_v8, %s1447_s11 }
 0x1e3   : > { %638 = vmax.xlane.f32.xlu0 %v637_v39 }
 0x1eb   : > { %851 = vmax.xlane.f32.xlu0 %v850_v41 }
 0x1ff   : > { %577 = vrot.lane.b32.xlu0 %v1602_v8, %s1448_s12 }
 0x218   : > { %v360_v42 = vpop.xlane.xlu0 %359 }
 0x219   : > { %v361_v43 = vsub.f32 %v354_v26, %v360_v42 }
 0x21b   : > { %v362_v44 = vmul.f32 1.442695, %v361_v43 }
 0x21d   : > { %1214 = vpow2.f32 %v362_v44 }
 0x223   : > { %v1652_v45 = vpop.eup %1214 }
 0x224   : > { %v364_v46 = vsel %vm357_vm2, %v1652_v45, 0.0 }
 0x225   : > { %v568_v47 = vpop.xlane.xlu2 %567  ;;  %365 = vadd.xlane.f32.xlu1 %v364_v46 }
 0x226   : > { %v569_v48 = vsub.f32 %v563_v29, %v568_v47  ;;  %v426_v49 = vpop.xlane.xlu1 %425 }
 0x227   : > { %v427_v51 = vsub.f32 %v421_v30, %v426_v49 }
 0x228   : > { %v570_v50 = vmul.f32 1.442695, %v569_v48 }
 0x229   : > { %v428_v53 = vmul.f32 1.442695, %v427_v51 }
 0x22a   : > { %1216 = vpow2.f32 %v570_v50 }
 0x22b   : > { %v507_v52 = vpop.permute.xlu0 %506  ;;  %1218 = vpow2.f32 %v428_v53 }
 0x22c   : > { %527 = vmatpush.msrb.mxu3 %v507_v52 }
 0x22d   : > { %v497_v54 = vpop.xlane.xlu2 %496 }
 0x22e   : > { %v498_v55 = vsub.f32 %v492_v28, %v497_v54  ;;  %v710_v56 = vpop.xlane.xlu1 %709 }
 0x22f   : > { %v711_v59 = vsub.f32 %v705_v34, %v710_v56 }
 0x230   : > { %v1656_v57 = vpop.eup %1216  ;;  %v499_v58 = vmul.f32 1.442695, %v498_v55 }
 0x231   : > { %v572_v60 = vsel %vm357_vm2, %v1656_v57, 0.0  ;;  %v712_v61 = vmul.f32 1.442695, %v711_v59  ;;  %v1219_v62 = vpop.eup %1218 }
 0x232   : > { %1220 = vpow2.f32 %v499_v58  ;;  %573 = vadd.xlane.f32.xlu2 %v572_v60  ;;  %v430_v0 = vsel %vm357_vm2, %v1219_v62, 0.0  ;;  %v899_v60 = vld [vmem:[#allocation9 + $0x18] sm:$0xff] }
 0x233   : > { %1222 = vpow2.f32 %v712_v61  ;;  %v898_v61 = vld [vmem:[#allocation9 + $0x10] sm:$0xff]  ;;  %915 = vmatpush.msra.mxu1 %v899_v60 }
 0x235   : > { %v781_v5 = vpop.xlane.xlu2 %780  ;;  %916 = vmatpush.msra.mxu1 %v898_v61 }
 0x236   : > { %v782_v9 = vsub.f32 %v776_v37, %v781_v5 }
 0x238   : > { %v1221_v63 = vpop.eup %1220  ;;  %v783_v11 = vmul.f32 1.442695, %v782_v9 }
 0x239   : > { %v501_v1 = vsel %vm357_vm2, %v1221_v63, 0.0  ;;  %v1662_v2 = vpop.eup %1222 }
 0x23a   : > { %431 = vadd.xlane.f32.xlu2 %v430_v0  ;;  %502 = vadd.xlane.f32.xlu1 %v501_v1  ;;  %v714_v3 = vsel %vm357_vm2, %v1662_v2, 0.0 }
 0x242   : > { %715 = vadd.xlane.f32.xlu2 %v714_v3 }
 0x246   : > { %v649_v4 = vpop.permute.xlu1 %648 }
 0x247   : > { %669 = vmatpush.msra.mxu3 %v649_v4  ;;  %v893_v4 = vld [vmem:[#allocation3] sm:$0xff] }
 0x253   : > { %790 = vrot.lane.b32.xlu1 %v1602_v8, %s1449_s13  ;;  %s946_s13 = scalar_lea.hbm %s1736_s5, %s1093_s10 }
 0x256   : > { %v639_v6 = vpop.xlane.xlu0 %638 }
 0x257   : > { %v640_v7 = vsub.f32 %v1641_v33, %v639_v6 }
 0x259   : > { %v641_v10 = vmul.f32 1.442695, %v640_v7  ;;  %v1213_v7 = vld [vmem:[%s1735_s4] ss:$0 sm:$0xff] }
 0x25b   : > { %1224 = vpow2.f32 %v641_v10  ;;  %861 = vrot.lane.b32.xlu1 %v1602_v8, %s1450_s15 }
 0x25c   : > { %1226 = vpow2.f32 %v783_v11 }
 0x25e   : > { %v852_v12 = vpop.xlane.xlu0 %851 }
 0x25f   : > { %v853_v13 = vsub.f32 %v847_v40, %v852_v12 }
 0x261   : > { %v1225_v14 = vpop.eup %1224  ;;  %v854_v15 = vmul.f32 1.442695, %v853_v13 }
 0x262   : > { %v643_v16 = vsel %vm357_vm2, %v1225_v14, 0.0  ;;  %v1227_v17 = vpop.eup %1226 }
 0x263   : > { %1228 = vpow2.f32 %v854_v15  ;;  %644 = vadd.xlane.f32.xlu2 %v643_v16  ;;  %v785_v19 = vsel %vm357_vm2, %v1227_v17, 0.0 }
 0x269   : > { %v1229_v18 = vpop.eup %1228 }
 0x26a   : > { %v856_v20 = vsel %vm357_vm2, %v1229_v18, 0.0 }
 0x26b   : > { %786 = vadd.xlane.f32.xlu2 %v785_v19  ;;  %857 = vadd.xlane.f32.xlu0 %v856_v20 }
 0x271   : > { %v578_v24 = vpop.permute.xlu0 %577 }
 0x283   : > { %719 = vrot.lane.b32.xlu2 %v1602_v8, %s1451_s24 }
 0x298   : > { %v366_v21 = vpop.xlane.xlu1 %365 }
 0x299   : > { %1230 = vrcp.f32 %v366_v21 }
 0x29f   : > { %v1231_v22 = vpop.eup %1230 }
 0x2a0   : > { %v368_v23 = vmul.f32 %v1231_v22, %v1652_v45 }
 0x2a2   : > { %1069 = vmatmul.msk.f32.vlgmr.msra.gmra.mxu2 %vm357_vm2, %v368_v23 }
 0x2a3   : > { %598 = vmatpush.msra.mxu2 %v578_v24 }
 0x2a5   : > { %v574_v25 = vpop.xlane.xlu2 %573 }
 0x2ad   : > { %v432_v26 = vpop.xlane.xlu2 %431  ;;  %v503_v27 = vpop.xlane.xlu1 %502 }
 0x2ae   : > { %1232 = vrcp.f32 %v432_v26 }
 0x2af   : > { %1234 = vrcp.f32 %v503_v27 }
 0x2b0   : > { %1236 = vrcp.f32 %v574_v25 }
 0x2b4   : > { %v1233_v28 = vpop.eup %1232 }
 0x2b5   : > { %v1235_v29 = vpop.eup %1234  ;;  %v434_v30 = vmul.f32 %v1233_v28, %v1219_v62  ;;  %v716_v34 = vpop.xlane.xlu2 %715  ;;  %v897_v62 = vld [vmem:[#allocation9 + $0x8] sm:$0xff] }
 0x2b6   : > { %v505_v31 = vmul.f32 %v1235_v29, %v1221_v63  ;;  %v1237_v8 = vpop.eup %1236  ;;  %v896_v63 = vld [vmem:[#allocation9] sm:$0xff]  ;;  %917 = vmatpush.msra.mxu1 %v897_v62 }
 0x2b7   : > { %1072 = vmatmul.msk.f32.vlgmr.msrb.gmra.mxu2 %vm357_vm2, %v434_v30  ;;  %v576_v32 = vmul.f32 %v1237_v8, %v1656_v57 }
 0x2b8   : > { %1075 = vmatmul.msk.f32.vlgmr.msrb.gmra.mxu3 %vm357_vm2, %v505_v31  ;;  %918 = vmatpush.msra.mxu1 %v896_v63 }
 0x2bf   : > { %1078 = vmatmul.msk.f32.vlgmr.msra.gmra.mxu2 %vm357_vm2, %v576_v32 }
 0x2c5   : > { %v791_v33 = vpop.permute.xlu1 %790 }
 0x2c6   : > { %811 = vmatpush.msrb.mxu3 %v791_v33 }
 0x2cd   : > { %v862_v45 = vpop.permute.xlu1 %861 }
 0x2d6   : > { %v645_v35 = vpop.xlane.xlu2 %644 }
 0x2d7   : > { %1238 = vrcp.f32 %v645_v35 }
 0x2d8   : > { %1240 = vrcp.f32 %v716_v34 }
 0x2dd   : > { %v1239_v36 = vpop.eup %1238 }
 0x2de   : > { %v647_v37 = vmul.f32 %v1239_v36, %v1225_v14  ;;  %v787_v38 = vpop.xlane.xlu2 %786  ;;  %v858_v39 = vpop.xlane.xlu0 %857 }
 0x2df   : > { %1242 = vrcp.f32 %v787_v38  ;;  %v1241_v40 = vpop.eup %1240 }
 0x2e0   : > { %1081 = vmatmul.msk.f32.vlgmr.msra.gmra.mxu3 %vm357_vm2, %v647_v37  ;;  %1244 = vrcp.f32 %v858_v39  ;;  %v718_v42 = vmul.f32 %v1241_v40, %v1662_v2 }
 0x2e5   : > { %v1243_v41 = vpop.eup %1242 }
 0x2e6   : > { %v789_v43 = vmul.f32 %v1243_v41, %v1227_v17  ;;  %v720_v44 = vpop.permute.xlu2 %719  ;;  %v1245_v46 = vpop.eup %1244 }
 0x2e7   : > { %740 = vmatpush.msrb.mxu2 %v720_v44  ;;  %v860_v47 = vmul.f32 %v1245_v46, %v1229_v18 }
 0x2e8   : > { %1084 = vmatmul.msk.f32.vlgmr.msrb.gmra.mxu2 %vm357_vm2, %v718_v42  ;;  %1087 = vmatmul.msk.f32.vlgmr.msrb.gmra.mxu3 %vm357_vm2, %v789_v43 }
 0x2e9   : > { %882 = vmatpush.msra.mxu2 %v862_v45 }
 0x2f0   : > { %1090 = vmatmul.msk.f32.vlgmr.msra.gmra.mxu2 %vm357_vm2, %v860_v47 }
 0x325   : > { %v392_v48 = vpop.f32.mrf.mxu2 }
 0x326   : > { %395 = vst.msk [vmem:[#allocation2] sm:$0xff] %vm332_vm1, %v392_v48 }
 0x33a   : > { %v458_v49 = vpop.f32.mrf.mxu2 }
 0x33b   : > { %v529_v50 = vpop.f32.mrf.mxu3  ;;  %462 = vrot.lane.b32.xlu1 %v458_v49, %s1452_s7  ;;  %s286_s7 = scalar_lea.vmem [#allocation10], %s1062_s17  ;;  %s1356_s17 = scalar_lea.hbm %s1736_s5, 16 }
 0x33c   : > { %533 = vrot.lane.b32.xlu2 %v529_v50, %s1453_s29  ;;  %s948_s29 = sshll.u32 %s286_s7, 4  ;;  %s949_s29 = int_to_ptr.vmem [resolvable:$true] %s948_s29 }
 0x342   : > { %v600_v51 = vpop.f32.mrf.mxu2 }
 0x343   : > { %604 = vrot.lane.b32.xlu1 %v600_v51, %s1454_s26  ;;  %s950_s26 = sshll.u32 %s946_s13, 4  ;;  %s951_s26 = int_to_ptr.hbm [resolvable:$true] %s950_s26 }
 0x363   : > { %v671_v52 = vpop.f32.mrf.mxu3 }
 0x364   : > { %675 = vrot.lane.b32.xlu2 %v671_v52, %s1455_s25  ;;  %s1350_s25 = sshra.s32 %s951_s26, 4  ;;  %s1351_s25 = int_to_ptr.hbm [resolvable:$true] %s1350_s25 }
 0x365   : > { %p1357_p9 = scmp.lt.s32.totalorder %s1351_s25, %s1736_s5 }
 0x36b   : > { %v742_v53 = vpop.f32.mrf.mxu2  ;;  %v813_v54 = vpop.f32.mrf.mxu3 }
 0x36c   : > { %817 = vrot.lane.b32.xlu0 %v813_v54, %s1456_s6  ;;  %746 = vrot.lane.b32.xlu1 %v742_v53, %s1457_s8  ;;  %s1352_s6 = scalar_lea.hbm %s1351_s25, 8 }
 0x36d   : > { %p1353_p1 = scmp.ne.s32.totalorder %s1351_s25, %s1352_s6  ;;  %p1358_p10 = scmp.lt.s32.totalorder %s1356_s17, %s1352_s6 }
 0x36f   : > { %p1354_p3 = pnand %p1353_p1, %p1563_p0  ;;  %p1359_p12 = por %p1358_p10, %p1357_p9 }
 0x371   : > { %p1355_p8 = pneg %p1354_p3 }
 0x373   : > { %v884_v55 = vpop.f32.mrf.mxu2  ;;  %p1360_p13 = pnand %p1359_p12, %p1355_p8 }
 0x374   : > { %888 = vrot.lane.b32.xlu2 %v884_v55, %s1458_s9 }
 0x396   : > { %v534_v57 = vpop.permute.xlu2 %533 }
 0x3ad   : > { %v463_v56 = vpop.permute.xlu1 %462 }
 0x3ae   : > { %466 = vst.msk [vmem:[#allocation2] sm:$0xff] %vm465_vm3, %v463_v56 }
 0x3af   : > { %537 = vst.msk [vmem:[#allocation2] sm:$0xff] %vm536_vm4, %v534_v57 }
 0x3b5   : > { %v605_v58 = vpop.permute.xlu1 %604 }
 0x3b6   : > { %608 = vst.msk [vmem:[#allocation2] sm:$0xff] %vm607_vm5, %v605_v58 }
 0x3be   : > { %v676_v59 = vpop.permute.xlu2 %675 }
 0x3bf   : > { %679 = vst.msk [vmem:[#allocation2] sm:$0xff] %vm678_vm6, %v676_v59 }
 0x3ce   : > { %v889_v2 = vpop.permute.xlu2 %888 }
 0x3de   : > { %v747_v0 = vpop.permute.xlu1 %746  ;;  %v818_v1 = vpop.permute.xlu0 %817 }
 0x3df   : > { %750 = vst.msk [vmem:[#allocation2] sm:$0xff] %vm749_vm7, %v747_v0 }
 0x3e0   : > { %821 = vst.msk [vmem:[#allocation2] sm:$0xff] %vm820_vm8, %v818_v1 }
 0x3e1   : > { %892 = vst.msk [vmem:[#allocation2] sm:$0xff] %vm891_vm9, %v889_v2 }
 0x3e8   : > { %v894_v3 = vld [vmem:[#allocation2] sm:$0xff] }
 0x3e9   : > { %1091 = vmatmul.msk.f32.vlgmr.msra.gmra.mxu1 %vm291_vm0, %v894_v3 }
 0x466   : > { %v920_v5 = vpop.f32.mrf.mxu1 }
 0x467   : > { %v923_v6 = vadd.f32 %v920_v5, %v893_v4 }
 0x469   : > { %924 = vst.msk [vmem:[#allocation3] sm:$0xff] %vm291_vm0, %v923_v6 }
 0x470   : > { %v928_v9 = vld [vmem:[#allocation3] sm:$0xff] }
 0x471   : > { %v933_v10 = vadd.f32 %v1213_v7, %v928_v9 }
 0x473   : > { %934 = vst.msk [vmem:[%s286_s7] sm:$0xff] %vm291_vm0, %v933_v10 }
 0x474   : > { %1363 = shalt.err (!%p1360_p13)
}
 0x475   : > { %1106 = dma.vmem_to_hbm [thread:$0]  (%p1563_p0), %s949_s29, 128, %s951_s26, %s936_s21  }
 0x476 PF: > { %s962_s16 = sand.u32 1, %s1402_s18   ;;  %p1120_p2 = pnand %p1058_p6, %p1570_p5 }
 0x477   : > { %s963_s12 = scalar_lea.sflag [#allocation6], %s962_s16 }
 0x478   : > { %p1121_p4 = pneg %p1120_p2 }
 0x47a   : > { %1397 = dma.done.wait (%p1121_p4), %s963_s12, 128  }
 0x47b   : > { %1399 = vsyncadd (%p1121_p4), %s963_s12, 4294967168  ;;  %s22_s23 = sadd.s32 1, %s1422_s23   ;;  %s1742_s18 = smov %s1406_s19 }
 0x47c   : > { %p19_p7 = scmp.ge.s32.totalorder %s22_s23, 4   ;;  %s1743_s19 = smov %s1410_s20 }
 0x47d   : > { %s1744_s20 = smov %s1568_s28  ;;  %s1745_s21 = smov %s1418_s22 }
 0x47e   : > { %s1746_s22 = smov %s1748_s14  ;;  %21 = sbr.rel (!%p19_p7) target bundleno = 7 (0x7), region = 104 }
 0x483   :  { %969 = vsyncpa [#allocation5], 1 }
 0x484   :  { %971 = vsyncpa [#allocation5 + $0x1], 1 }
 0x485   :  { %972 = vsyncpa [#allocation8], 1 }
 0x486   :  { %973 = vsyncpa [#allocation6], 1 }
 0x487   :  { %975 = vsyncpa [#allocation6 + $0x1], 1 }

</bundles_post_ra>
